<compile_context>
chip_gen: v5e
topology: v5e:2x2
jax: 0.10.0
libtpu: 0.0.40
codegen_flags: <defaults>
</compile_context>

<pallas_src>
import functools

import jax
import jax.numpy as jnp
from jax import lax
from jax.experimental import pallas as pl
from jax.experimental.pallas import tpu as pltpu

SCALE = 32.0
MARGIN = 0.2
_SENTINEL = -1e30  # class-pad value: scale*sentinel stays finite in f32, exp -> 0


def _round_up(x, m):
    return (x + m - 1) // m * m


def _cdiv(a, b):
    return -(-a // b)


def _select_tiles(B, C, itemsize, *, max_block_bytes=8 * 1024 * 1024,
                  max_tb=256, max_tc=8192):
    """Pick (tb, Bp, tc, Cp): class tile first, then pad C up to nc*tc."""
    Bp8 = _round_up(max(B, 1), 8)
    if Bp8 <= 8:
        tb = Bp8
    else:
        # Keep nb >= 2 so the "parallel" batch axis actually splits across
        # v7x's two TensorCores (cheap extra tile on single-TC v5e/v6e).
        tb = min(max_tb, _round_up(_cdiv(Bp8, 2), 8))
    Bp = _round_up(B, tb)

    # Class tile: largest 128-multiple within the per-buffer byte budget,
    # then balance so the padding Cp - C is minimal for that tile count.
    tc_cap = min(max_tc, max(128, (max_block_bytes // (tb * itemsize)) // 128 * 128))
    C128 = _round_up(C, 128)
    nc = _cdiv(C128, tc_cap)
    tc = _round_up(_cdiv(C, nc), 128)
    Cp = nc * tc
    return tb, Bp, tc, Cp


# ---------------------------------------------------------------------------
# Kernels
# ---------------------------------------------------------------------------

def _addmargin_single_kernel(cos_ref, lab_ref, tgt_ref, out_ref, *,
                             scale, margin, true_b, mask_b):
    """Single class block: plain LSE, 1-D grid over batch tiles."""
    i = pl.program_id(0)
    tb, tc = cos_ref.shape

    cos = cos_ref[...].astype(jnp.float32)                      # [tb, tc]
    lab = lab_ref[...]                                          # [tb, 1] int32
    col = lax.broadcasted_iota(jnp.int32, (tb, tc), 1)          # local column id
    is_target = col == lab

    logits = cos * scale
    logits = jnp.where(is_target, logits - scale * margin, logits)

    m = jnp.max(logits, axis=-1, keepdims=True)                 # [tb, 1]
    lse = m + jnp.log(jnp.sum(jnp.exp(logits - m), axis=-1, keepdims=True))

    per_example = lse - scale * (tgt_ref[...] - margin)         # [tb, 1]
    if mask_b:  # static: only traced when the batch axis was padded
        row = lax.broadcasted_iota(jnp.int32, (tb, 1), 0) + i * tb
        per_example = jnp.where(row < true_b, per_example, 0.0)
    out_ref[...] = per_example


def _addmargin_stream_kernel(cos_ref, lab_ref, tgt_ref, out_ref, m_sc, l_sc, *,
                             scale, margin, true_b, mask_b):
    """Streaming (online) LSE over class tiles; class axis is innermost."""
    i = pl.program_id(0)          # batch tile ("parallel")
    j = pl.program_id(1)          # class tile (reduction, "arbitrary")
    tb, tc = cos_ref.shape

    @pl.when(j == 0)
    def _init():
        m_sc[...] = jnp.full(m_sc.shape, -jnp.inf, dtype=m_sc.dtype)
        l_sc[...] = jnp.zeros(l_sc.shape, dtype=l_sc.dtype)

    cos = cos_ref[...].astype(jnp.float32)                      # [tb, tc]
    # Local iota + shifted label: the j*tc shift is a [tb,1]-width op only.
    lab_local = lab_ref[...] - j * tc                           # [tb, 1]
    col = lax.broadcasted_iota(jnp.int32, (tb, tc), 1)
    is_target = col == lab_local

    logits = cos * scale
    logits = jnp.where(is_target, logits - scale * margin, logits)
    # Padded class columns carry the -1e30 sentinel from the wrapper:
    # exp(scale*sentinel - m) underflows to 0, so no in-kernel masking needed.

    tile_max = jnp.max(logits, axis=-1, keepdims=True)          # [tb, 1]
    m_prev = m_sc[...]
    m_new = jnp.maximum(m_prev, tile_max)
    alpha = jnp.exp(m_prev - m_new)
    p = jnp.exp(logits - m_new)
    l_sc[...] = alpha * l_sc[...] + jnp.sum(p, axis=-1, keepdims=True)
    m_sc[...] = m_new

    @pl.when(j == pl.num_programs(1) - 1)
    def _finalize():
        lse = m_sc[...] + jnp.log(l_sc[...])                    # [tb, 1]
        per_example = lse - scale * (tgt_ref[...] - margin)
        if mask_b:  # static: only traced when the batch axis was padded
            row = lax.broadcasted_iota(jnp.int32, (tb, 1), 0) + i * tb
            per_example = jnp.where(row < true_b, per_example, 0.0)
        out_ref[...] = per_example


# ---------------------------------------------------------------------------
# Wrapper
# ---------------------------------------------------------------------------

def add_margin_loss(cosine, label, *, scale=SCALE, margin=MARGIN,
                    block_b=None, block_c=None):
    """cosine: [B, C] (any float dtype), label: [B] int class ids -> scalar loss."""
    B, C = cosine.shape
    itemsize = jnp.dtype(cosine.dtype).itemsize

    if block_b is not None or block_c is not None:
        tb = _round_up(block_b, 8) if block_b is not None else _select_tiles(B, C, itemsize)[0]
        tc = _round_up(block_c, 128) if block_c is not None else _select_tiles(B, C, itemsize)[2]
        Bp, Cp = _round_up(B, tb), _round_up(C, tc)
    else:
        tb, Bp, tc, Cp = _select_tiles(B, C, itemsize)
    nb, nc = Bp // tb, Cp // tc

    label2d = label.astype(jnp.int32).reshape(B, 1)
    # Gather the target cosine in the wrapper (touches only B elements).
    cos_target = jnp.take_along_axis(cosine, label2d, axis=1).astype(jnp.float32)

    if Bp != B or Cp != C:
        # Sentinel padding for class columns: no in-kernel pad masking needed.
        cosine = jnp.pad(cosine, ((0, Bp - B), (0, Cp - C)),
                         constant_values=_SENTINEL)
        label2d = jnp.pad(label2d, ((0, Bp - B), (0, 0)))
        cos_target = jnp.pad(cos_target, ((0, Bp - B), (0, 0)))

    block_bytes = tb * tc * itemsize
    vmem_limit = int(min(48 * 1024 * 1024,
                         max(32 * 1024 * 1024, 2 * block_bytes + 4 * 1024 * 1024)))
    mask_b = Bp != B

    if nc == 1:
        kernel = functools.partial(
            _addmargin_single_kernel,
            scale=float(scale), margin=float(margin), true_b=B, mask_b=mask_b)
        per_example = pl.pallas_call(
            kernel,
            out_shape=jax.ShapeDtypeStruct((Bp, 1), jnp.float32),
            grid=(nb,),
            in_specs=[
                pl.BlockSpec((tb, tc), lambda i: (i, 0)),   # cosine (native dtype)
                pl.BlockSpec((tb, 1), lambda i: (i, 0)),    # label
                pl.BlockSpec((tb, 1), lambda i: (i, 0)),    # target cosine (f32)
            ],
            out_specs=pl.BlockSpec((tb, 1), lambda i: (i, 0)),
            compiler_params=pltpu.CompilerParams(
                dimension_semantics=("parallel",),
                vmem_limit_bytes=vmem_limit,
            ),
        )(cosine, label2d, cos_target)
    else:
        kernel = functools.partial(
            _addmargin_stream_kernel,
            scale=float(scale), margin=float(margin), true_b=B, mask_b=mask_b)
        per_example = pl.pallas_call(
            kernel,
            out_shape=jax.ShapeDtypeStruct((Bp, 1), jnp.float32),
            grid=(nb, nc),
            in_specs=[
                pl.BlockSpec((tb, tc), lambda i, j: (i, j)),  # cosine (native dtype)
                pl.BlockSpec((tb, 1), lambda i, j: (i, 0)),   # label, j-invariant
                pl.BlockSpec((tb, 1), lambda i, j: (i, 0)),   # target cosine, j-invariant
            ],
            out_specs=pl.BlockSpec((tb, 1), lambda i, j: (i, 0)),
            scratch_shapes=[pltpu.VMEM((tb, 1), jnp.float32)] * 2,  # m, l
            compiler_params=pltpu.CompilerParams(
                dimension_semantics=("parallel", "arbitrary"),
                vmem_limit_bytes=vmem_limit,
            ),
        )(cosine, label2d, cos_target)

    return jnp.sum(per_example) / B


# ---------------------------------------------------------------------------
# Reference + tests
# ---------------------------------------------------------------------------

def _reference(cosine, label):
    # pure-JAX reference matching the PyTorch module's forward
    C = cosine.shape[1]
    one_hot = jax.nn.one_hot(label, C, dtype=jnp.float32)
    logits = SCALE * (cosine.astype(jnp.float32) - MARGIN * one_hot)
    logp = jax.nn.log_softmax(logits, axis=-1)
    return -jnp.mean(jnp.sum(one_hot * logp, axis=-1))


if __name__ == "__main__":
    key = jax.random.PRNGKey(0)
    k1, k2, k3, k4 = jax.random.split(key, 4)

    # Case 1: small single-block shapes (B=8, C=128) — 1-D grid fast path.
    B, C = 8, 128
    cosine = jnp.tanh(jax.random.normal(k1, (B, C), dtype=jnp.float32))
    label = jax.random.randint(k2, (B,), 0, C, dtype=jnp.int32)
    loss = add_margin_loss(cosine, label)
    jax.block_until_ready(loss)
    ref = _reference(cosine, label)
    assert jnp.allclose(loss, ref, atol=1e-4, rtol=1e-4), (loss, ref)

    # Case 2: forced multi-tile grid — exercises the streaming LSE and the
    # "parallel" batch axis with per-tile finalize.
    B2, C2 = 16, 512
    cosine2 = jnp.tanh(jax.random.normal(k3, (B2, C2), dtype=jnp.float32))
    label2 = jax.random.randint(k4, (B2,), 0, C2, dtype=jnp.int32)
    loss2 = add_margin_loss(cosine2, label2, block_b=8, block_c=128)
    jax.block_until_ready(loss2)
    ref2 = _reference(cosine2, label2)
    assert jnp.allclose(loss2, ref2, atol=1e-4, rtol=1e-4), (loss2, ref2)

    # Case 3: non-divisible shapes, streaming path — sentinel column padding
    # plus padded-row masking at finalize.
    B3, C3 = 10, 200
    cosine3 = jnp.tanh(jax.random.normal(k1, (B3, C3), dtype=jnp.float32))
    label3 = jax.random.randint(k2, (B3,), 0, C3, dtype=jnp.int32)
    loss3 = add_margin_loss(cosine3, label3, block_b=8, block_c=128)
    jax.block_until_ready(loss3)
    ref3 = _reference(cosine3, label3)
    assert jnp.allclose(loss3, ref3, atol=1e-4, rtol=1e-4), (loss3, ref3)

    # Case 4: non-divisible shapes with automatic tiling — single-block path
    # with sentinel padding + row masking.
    loss3b = add_margin_loss(cosine3, label3)
    jax.block_until_ready(loss3b)
    assert jnp.allclose(loss3b, ref3, atol=1e-4, rtol=1e-4), (loss3b, ref3)

    # Case 5: bf16 input, upcast inside the kernel (streaming and single paths).
    cosine_bf = cosine2.astype(jnp.bfloat16)
    loss4 = add_margin_loss(cosine_bf, label2, block_b=8, block_c=128)
    jax.block_until_ready(loss4)
    ref4 = _reference(cosine_bf.astype(jnp.float32), label2)
    assert jnp.allclose(loss4, ref4, atol=1e-3, rtol=1e-3), (loss4, ref4)
    loss5 = add_margin_loss(cosine_bf, label2)
    jax.block_until_ready(loss5)
    assert jnp.allclose(loss5, ref4, atol=1e-3, rtol=1e-3), (loss5, ref4)

    print("KERNEL_OK")
</pallas_src>

<mosaic_0001>
module attributes {stable_mosaic.version = 11 : i64} {
  func.func @_addmargin_single_kernel(%arg0: i32, %arg1: memref<8x128xf32, #tpu.memory_space<vmem>>, %arg2: memref<8x1xi32, #tpu.memory_space<vmem>>, %arg3: memref<8x1xf32, #tpu.memory_space<vmem>>, %arg4: memref<8x1xf32, #tpu.memory_space<vmem>>) attributes {dimension_semantics = [#tpu.dimension_semantics<parallel>], iteration_bounds = array<i64: 1>, scalar_prefetch = 0 : i64, scratch_operands = 0 : i64, tpu.core_type = #tpu.core_type<tc>, window_params = [{transform_indices = @transform_0, window_bounds = array<i64: 8, 128>}, {transform_indices = @transform_1, window_bounds = array<i64: 8, 1>}, {transform_indices = @transform_2, window_bounds = array<i64: 8, 1>}, {transform_indices = @transform_3, window_bounds = array<i64: 8, 1>}]} {
    %c0 = arith.constant 0 : index
    %c0_0 = arith.constant 0 : index
    %0 = vector.load %arg1[%c0, %c0_0] : memref<8x128xf32, #tpu.memory_space<vmem>>, vector<8x128xf32>
    %c0_1 = arith.constant 0 : index
    %c0_2 = arith.constant 0 : index
    %1 = vector.load %arg2[%c0_1, %c0_2] : memref<8x1xi32, #tpu.memory_space<vmem>>, vector<8x1xi32>
    %2 = tpu.iota {dimensions = array<i32: 1>} : vector<8x128xi32>
    %3 = vector.broadcast %1 : vector<8x1xi32> to vector<8x128xi32>
    %4 = arith.cmpi eq, %2, %3 : vector<8x128xi32>
    %cst = arith.constant 3.200000e+01 : f32
    %5 = vector.broadcast %cst : f32 to vector<8x128xf32>
    %6 = arith.mulf %0, %5 : vector<8x128xf32>
    %cst_3 = arith.constant 6.400000e+00 : f32
    %7 = vector.broadcast %cst_3 : f32 to vector<8x128xf32>
    %8 = arith.subf %6, %7 : vector<8x128xf32>
    %9 = arith.select %4, %8, %6 : vector<8x128xi1>, vector<8x128xf32>
    %cst_4 = arith.constant dense<0xFF800000> : vector<8xf32>
    %10 = vector.multi_reduction <maximumf>, %9, %cst_4 [1] : vector<8x128xf32> to vector<8xf32>
    %11 = vector.shape_cast %10 : vector<8xf32> to vector<8x1xf32>
    %12 = vector.broadcast %11 : vector<8x1xf32> to vector<8x128xf32>
    %13 = arith.subf %9, %12 : vector<8x128xf32>
    %14 = math.exp %13 : vector<8x128xf32>
    %cst_5 = arith.constant dense<0.000000e+00> : vector<8xf32>
    %15 = vector.multi_reduction <add>, %14, %cst_5 [1] : vector<8x128xf32> to vector<8xf32>
    %16 = vector.shape_cast %15 : vector<8xf32> to vector<8x1xf32>
    %17 = math.log %16 : vector<8x1xf32>
    %18 = arith.addf %11, %17 : vector<8x1xf32>
    %c0_6 = arith.constant 0 : index
    %c0_7 = arith.constant 0 : index
    %19 = vector.load %arg3[%c0_6, %c0_7] : memref<8x1xf32, #tpu.memory_space<vmem>>, vector<8x1xf32>
    %cst_8 = arith.constant 2.000000e-01 : f32
    %20 = vector.broadcast %cst_8 : f32 to vector<8x1xf32>
    %21 = arith.subf %19, %20 : vector<8x1xf32>
    %cst_9 = arith.constant 3.200000e+01 : f32
    %22 = vector.broadcast %cst_9 : f32 to vector<8x1xf32>
    %23 = arith.mulf %22, %21 : vector<8x1xf32>
    %24 = arith.subf %18, %23 : vector<8x1xf32>
    %c0_10 = arith.constant 0 : index
    %c0_11 = arith.constant 0 : index
    %25 = vector.load %arg4[%c0_10, %c0_11] : memref<8x1xf32, #tpu.memory_space<vmem>>, vector<8x1xf32>
    tpu.vector_store %arg4[%c0_10, %c0_11], %24 {strides = array<i32>} : memref<8x1xf32, #tpu.memory_space<vmem>>, vector<8x1xf32>,
    return
  }
  func.func @transform_0(%arg0: i32) -> (i32, i32) {
    %c0_i32 = arith.constant 0 : i32
    %c0_i32_0 = arith.constant 0 : i32
    return %arg0, %c0_i32 : i32, i32
  }
  func.func @transform_1(%arg0: i32) -> (i32, i32) {
    %c0_i32 = arith.constant 0 : i32
    %c0_i32_0 = arith.constant 0 : i32
    return %arg0, %c0_i32 : i32, i32
  }
  func.func @transform_2(%arg0: i32) -> (i32, i32) {
    %c0_i32 = arith.constant 0 : i32
    %c0_i32_0 = arith.constant 0 : i32
    return %arg0, %c0_i32 : i32, i32
  }
  func.func @transform_3(%arg0: i32) -> (i32, i32) {
    %c0_i32 = arith.constant 0 : i32
    %c0_i32_0 = arith.constant 0 : i32
    return %arg0, %c0_i32 : i32, i32
  }
}

</mosaic_0001>

<bundles_post_ra>
// kernel: tpu_custom_call.1
= control target key start
LH: loop header
LB: loop body
LE: loop exit
PB: predicated region body
PF: predicated region fallthrough
CT: control target
= control target key end

     0   :  { %v53_v0 = vmov 0   ;;  %v16_v3 = vlaneseq  ;;  %vm39_vm1 = vcmask 7168   ;;  %s86_s1 = inlined_call_operand.vmem [shape: s32[8,1], index: 1, kind: input, shape index: {}]   ;;  %s87_s0 = inlined_call_operand.vmem [shape: f32[8,128], index: 0, kind: input, shape index: {}]   ;;  %s88_s2 = inlined_call_operand.vmem [shape: f32[8,1], index: 2, kind: input, shape index: {}]   ;;  %s89_s3 = inlined_call_operand.vmem [shape: f32[8,1], index: 3, kind: output, shape index: {}]  }
   0x1   :  { %48 = vset.pattern.permute.xlu0 %v53_v0  ;;  %v15_v1 = vld [vmem:[%s86_s1] sm:$0xff] }
   0x2   :  { %19 = vperm.xlu0 %48, %v15_v1   ;;  %v14_v2 = vld [vmem:[%s87_s0] sm:$0xff]  ;;  %v17_v5 = vand.u32 127, %v16_v3 }
   0x3   :  { %v22_v4 = vmul.f32 32.0, %v14_v2  ;;  %v35_v14 = vld [vmem:[%s88_s2] sm:$0xff] }
   0x4   :  { %v46_v15 = vadd.f32 -0.2, %v35_v14 }
   0x5   :  { %v45_v6 = vadd.f32 -6.4, %v22_v4 }
   0x6   :  { %v37_v17 = vmul.f32 32.0, %v46_v15 }
  0x74   :  { %v20_v7 = vpop.permute.xlu0 %19 }
  0x75   :  { %vm21_vm0 = vcmp.eq.s32.totalorder %v17_v5, %v20_v7 }
  0x76   :  { %v24_v8 = vsel %vm21_vm0, %v45_v6, %v22_v4 }
  0x77   :  { %25 = vmax.xlane.f32.xlu0 %v24_v8 }
  0xea   :  { %v26_v9 = vpop.xlane.xlu0 %25 }
  0xeb   :  { %v27_v10 = vsub.f32 %v24_v8, %v26_v9 }
  0xed   :  { %v28_v11 = vmul.f32 1.442695, %v27_v10 }
  0xef   :  { %49 = vpow2.f32 %v28_v11 }
  0xf5   :  { %v50_v12 = vpop.eup %49 }
  0xf6   :  { %30 = vadd.xlane.f32.xlu1 %v50_v12 }
 0x169   :  { %v31_v13 = vpop.xlane.xlu1 %30 }
 0x16a   :  { %51 = vlog2.f32 %v31_v13 }
 0x170   :  { %v52_v16 = vpop.eup %51 }
 0x171   :  { %v33_v18 = vmul.f32 0.6931472, %v52_v16 }
 0x173   :  { %v34_v19 = vadd.f32 %v33_v18, %v26_v9 }
 0x175   :  { %v38_v20 = vsub.f32 %v34_v19, %v37_v17 }
 0x177   :  { %40 = vst.msk [vmem:[%s89_s3] sm:$0xff] %vm39_vm1, %v38_v20 }

</bundles_post_ra>
